<compile_context>
chip_gen: v7x
topology: tpu7x:2x2x1
jax: 0.10.0
libtpu: 0.0.40
codegen_flags: <defaults>
</compile_context>

<pallas_src>
import jax
import jax.numpy as jnp
from jax.experimental import pallas as pl
from jax.experimental.pallas import tpu as pltpu

_LANE = 128


# --------------------------------------------------------------------------- #
# Kernel body
# --------------------------------------------------------------------------- #
def _make_kernel(*, n_k, use_acc, slice_noise, tile_k):
    """Kernel for one (row-tile i, K-tile k) grid step -> (C, tile_m) chunk."""

    def kernel(x_ref, nT_ref, o_ref, *scratch):
        k = pl.program_id(1)

        if slice_noise:
            # Whole [C, K] noise is VMEM-resident (fetched once); take this
            # step's K-chunk.  tile_k is a multiple of 128 on this path.
            off = pl.multiple_of(k * tile_k, _LANE)
            n_tile = nT_ref[:, pl.ds(off, tile_k)]
        else:
            n_tile = nT_ref[...]

        # A.B^T on the MXU: contract both operands on their last (K) dim.
        #   n_tile: (C, tile_k), x tile: (tile_m, tile_k) -> (C, tile_m)
        contrib = jax.lax.dot_general(
            n_tile, x_ref[...],
            dimension_numbers=(((1,), (1,)), ((), ())),
            preferred_element_type=jnp.float32,
        )

        if n_k == 1:
            # Single K step: write straight through, no accumulator needed.
            o_ref[...] = contrib.astype(o_ref.dtype)
        elif not use_acc:
            # f32 output: the output tile is VMEM-resident across the k axis
            # (its block index only depends on i) -> accumulate in place.
            @pl.when(k == 0)
            def _():
                o_ref[...] = jnp.zeros_like(o_ref)

            o_ref[...] += contrib
        else:
            # Narrow output dtype: f32 scratch accumulator, cast once at end.
            acc_ref = scratch[0]

            @pl.when(k == 0)
            def _():
                acc_ref[...] = jnp.zeros_like(acc_ref)

            acc_ref[...] += contrib

            @pl.when(k == n_k - 1)
            def _():
                o_ref[...] = acc_ref[...].astype(o_ref.dtype)

    return kernel


# --------------------------------------------------------------------------- #
# Tiling helpers
# --------------------------------------------------------------------------- #
def _vmem_capacity_bytes():
    """Physical VMEM of the attached TPU; conservative 64 MiB (v7x) if unknown."""
    try:
        return int(pltpu.get_tpu_info().vmem_capacity_bytes)
    except Exception:
        return 64 * 1024 * 1024


def _round_up(v, m):
    return -(-v // m) * m


def _largest_aligned_divisor(n, cap, align=_LANE):
    best = None
    d = align
    while d <= min(cap, n):
        if n % d == 0:
            best = d
        d += align
    return best


def _choose_tiles(N, K, C, in_itemsize, out_itemsize, out_is_f32, budget,
                  max_tile_m, max_tile_k):
    # ---- K tiling -----------------------------------------------------------
    if K <= max_tile_k or K % _LANE != 0:
        # Keep K whole.  (Splitting K with a non-dividing tile would feed
        # garbage into the contraction; we only split along aligned divisors.)
        # TODO(synk): zero-pad K to a 128 multiple for pathological large,
        # unaligned K instead of keeping the full contraction dim resident.
        tile_k = K
    else:
        tile_k = _largest_aligned_divisor(K, max_tile_k) or K
    n_k = K // tile_k

    # ---- noise residency ------------------------------------------------------
    noise_full_alloc = 2 * C * K * in_itemsize          # double-buffer allocation
    noise_resident = (n_k == 1) or (noise_full_alloc <= budget // 2)
    noise_alloc = (noise_full_alloc if noise_resident
                   else 2 * C * tile_k * in_itemsize)

    use_acc = (n_k > 1) and (not out_is_f32)

    # ---- row tile -------------------------------------------------------------
    per_m = (2 * tile_k * in_itemsize          # x tile, double-buffered
             + 2 * C * out_itemsize            # output tile, double-buffered
             + (C * 4 if use_acc else 0))      # f32 accumulator (if any)
    avail = max(budget - noise_alloc, per_m * _LANE)
    tile_m = min(avail // per_m, max_tile_m)
    # No point exceeding (rounded-up) N.
    tile_m = min(tile_m, _round_up(N, _LANE))
    # Megacore (v7x has 2 TensorCores): keep >= 2 row tiles when N allows.
    if N >= 2 * _LANE:
        tile_m = min(tile_m, _round_up((N + 1) // 2, _LANE))
    tile_m = max((tile_m // _LANE) * _LANE, _LANE)
    return tile_m, tile_k, n_k, noise_resident, use_acc


# --------------------------------------------------------------------------- #
# Pallas wrapper
# --------------------------------------------------------------------------- #
def sub_noise_matmul(x, noise_t, *, out_dtype=jnp.float32,
                     max_tile_m=8192, max_tile_k=2048):
    """(x @ noise_t.T).T == noise_t-contract-x, as a single Pallas TPU kernel.

    x:       [N, K]   (N = H*W)
    noise_t: [C, K]   (C = 3 * num_noises, noise already transposed)
    returns  [C, N]   in out_dtype (the transpose is fused into the kernel).
    """
    N, K = x.shape
    C, K2 = noise_t.shape
    assert K == K2, "contraction dims must match"
    assert x.dtype == noise_t.dtype, "x and noise must share the streaming dtype"

    in_itemsize = jnp.dtype(x.dtype).itemsize
    out_itemsize = jnp.dtype(out_dtype).itemsize
    out_is_f32 = jnp.dtype(out_dtype) == jnp.dtype(jnp.float32)

    capacity = _vmem_capacity_bytes()
    # Never ask for more than ~85% of physical VMEM (v7x = 64 MiB total).
    vmem_limit = min(int(0.85 * capacity), 110 * 1024 * 1024)
    budget = int(0.55 * vmem_limit)          # headroom for compiler internals

    tile_m, tile_k, n_k, noise_resident, use_acc = _choose_tiles(
        N, K, C, in_itemsize, out_itemsize, out_is_f32, budget,
        max_tile_m, max_tile_k)

    num_i = pl.cdiv(N, tile_m)
    grid = (num_i, n_k)

    if noise_resident:
        # Constant block index -> the [C, K] noise matrix is DMA'd once and
        # stays resident across the whole grid.
        noise_spec = pl.BlockSpec((C, K), lambda i, k: (0, 0))
        slice_noise = n_k > 1
    else:
        # Fallback for very large K*C: K-chunk re-fetched per row tile.
        # TODO(synk): add a C grid axis for very large C so noise/out blocks
        # don't scale with full C (keeps v7x's 64 MiB happy at GeoDA scale).
        noise_spec = pl.BlockSpec((C, tile_k), lambda i, k: (0, k))
        slice_noise = False

    kernel = _make_kernel(n_k=n_k, use_acc=use_acc,
                          slice_noise=slice_noise, tile_k=tile_k)
    scratch_shapes = ([pltpu.VMEM((C, tile_m), jnp.float32)] if use_acc else [])

    noise_fetches = 1 if noise_resident else num_i * n_k
    noise_bytes_per_fetch = C * (K if noise_resident else tile_k) * in_itemsize
    cost = pl.CostEstimate(
        flops=2 * N * K * C,
        transcendentals=0,
        bytes_accessed=(N * K * in_itemsize
                        + noise_fetches * noise_bytes_per_fetch
                        + C * N * out_itemsize),
    )

    vmem_est = (2 * tile_m * tile_k * in_itemsize
                + (2 * C * K * in_itemsize if noise_resident
                   else 2 * C * tile_k * in_itemsize)
                + 2 * C * tile_m * out_itemsize
                + (C * tile_m * 4 if use_acc else 0))
    compiler_kwargs = dict(dimension_semantics=("parallel", "arbitrary"))
    if vmem_est > 12 * 1024 * 1024:
        compiler_kwargs["vmem_limit_bytes"] = int(
            min(vmem_limit, max(2 * vmem_est, 32 * 1024 * 1024)))

    out = pl.pallas_call(
        kernel,
        out_shape=jax.ShapeDtypeStruct((C, N), out_dtype),
        grid_spec=pltpu.PrefetchScalarGridSpec(
            num_scalar_prefetch=0,
            grid=grid,
            in_specs=[
                # x row/K tile: (tile_m, tile_k); K on lanes (full K or 128-mult).
                pl.BlockSpec((tile_m, tile_k), lambda i, k: (i, k)),
                noise_spec,
            ],
            # Lane-dense output: last dim is tile_m (multiple of 128).
            out_specs=pl.BlockSpec((C, tile_m), lambda i, k: (0, i)),
            scratch_shapes=scratch_shapes,
        ),
        compiler_params=pltpu.CompilerParams(**compiler_kwargs),
        cost_estimate=cost,
    )(x, noise_t)
    return out


def sub_noise_forward(x, num_noises, key, *, height=224, width=224,
                      compute_dtype=jnp.bfloat16, out_dtype=jnp.float32):
    """SubNoise.forward: noise ~ N(0,1), P^T = (x @ noise)^T, viewed as NCHW.

    `x` should already be in `compute_dtype` — GeoDA reuses the same subspace
    matrix for every call, so cast it once at the caller; the cast here is
    only a fallback.  bf16 streaming deviates slightly from torch's f32 matmul
    (acceptable for random-noise generation; pass compute_dtype=jnp.float32 to
    match exactly).  out_dtype=bf16 halves the [C, N] writeback if desired.
    """
    N, K = x.shape
    C = 3 * num_noises
    if x.dtype != jnp.dtype(compute_dtype):
        x = x.astype(compute_dtype)          # fallback; prefer pre-cast x
    # torch.randn([K, C]) transposed: generated directly as [C, K] (iid normal,
    # so the transpose is distributionally identical) in the compute dtype.
    noise_t = jax.random.normal(key, (C, K), dtype=compute_dtype)
    p_t = sub_noise_matmul(x, noise_t, out_dtype=out_dtype)      # [C, N]
    # Row-major view == torch .view([num_noises, 3, H, W]).
    return p_t.reshape(num_noises, 3, height, width)


# --------------------------------------------------------------------------- #
# Self-check
# --------------------------------------------------------------------------- #
if __name__ == "__main__":
    # Small shapes consistent with the module: spatial 16x16 instead of 224x224,
    # subspace dim K=32, num_noises=4  ->  C = 12 noise channels.
    H = W = 16
    N = H * W            # 256 flattened pixels
    K = 32               # subspace dimension (x.shape[1])
    NUM_NOISES = 4
    C = 3 * NUM_NOISES

    key = jax.random.PRNGKey(0)
    kx, kn = jax.random.split(key)

    # Deterministic "subspace" matrix x: [H*W, K]; cast to bf16 ONCE (as the
    # real caller would, since x is reused every query).
    x = jax.random.normal(kx, (N, K), dtype=jnp.float32)
    x_bf16 = x.astype(jnp.bfloat16)

    out = sub_noise_forward(x_bf16, NUM_NOISES, kn, height=H, width=W)
    out = jax.block_until_ready(out)

    # Pure-JAX reference with the identical bf16 inputs, f32 math.
    noise_t_ref = jax.random.normal(kn, (C, K), dtype=jnp.bfloat16)
    ref = jnp.dot(x_bf16.astype(jnp.float32),
                  noise_t_ref.astype(jnp.float32).T,
                  precision=jax.lax.Precision.HIGHEST)           # [N, C]
    ref = ref.T.reshape(NUM_NOISES, 3, H, W)

    assert out.shape == (NUM_NOISES, 3, H, W)
    assert out.dtype == jnp.float32
    assert jnp.allclose(out, ref, atol=1e-3, rtol=1e-3), (
        float(jnp.max(jnp.abs(out - ref))))

    print("KERNEL_OK")
</pallas_src>

<mosaic_0001>
module attributes {stable_mosaic.version = 11 : i64} {
  func.func @kernel(%arg0: i32, %arg1: i32, %arg2: memref<128x32xbf16, #tpu.memory_space<vmem>>, %arg3: memref<12x32xbf16, #tpu.memory_space<vmem>>, %arg4: memref<12x128xf32, #tpu.memory_space<vmem>>) attributes {dimension_semantics = [#tpu.dimension_semantics<parallel>, #tpu.dimension_semantics<arbitrary>], iteration_bounds = array<i64: 2, 1>, scalar_prefetch = 0 : i64, scratch_operands = 0 : i64, tpu.core_type = #tpu.core_type<tc>, window_params = [{transform_indices = @transform_0, window_bounds = array<i64: 128, 32>}, {pipeline_mode = #tpu.pipeline_mode<synchronous>, transform_indices = @transform_1, window_bounds = array<i64: 12, 32>}, {transform_indices = @transform_2, window_bounds = array<i64: 12, 128>}]} {
    %c0 = arith.constant 0 : index
    %c0_0 = arith.constant 0 : index
    %0 = vector.load %arg3[%c0, %c0_0] : memref<12x32xbf16, #tpu.memory_space<vmem>>, vector<12x32xbf16>
    %c0_1 = arith.constant 0 : index
    %c0_2 = arith.constant 0 : index
    %1 = vector.load %arg2[%c0_1, %c0_2] : memref<128x32xbf16, #tpu.memory_space<vmem>>, vector<128x32xbf16>
    %cst = arith.constant dense<0.000000e+00> : vector<12x128xf32>
    %2 = tpu.matmul %0, %1, %cst {dimension_numbers = #tpu.dot_dimension_numbers<[1], [1], [0], [0], [0, 0, 1, 0], [], []>} : vector<12x32xbf16>, vector<128x32xbf16>, vector<12x128xf32> -> vector<12x128xf32>
    %c0_3 = arith.constant 0 : index
    %c0_4 = arith.constant 0 : index
    %3 = vector.load %arg4[%c0_3, %c0_4] : memref<12x128xf32, #tpu.memory_space<vmem>>, vector<12x128xf32>
    tpu.vector_store %arg4[%c0_3, %c0_4], %2 {strides = array<i32>} : memref<12x128xf32, #tpu.memory_space<vmem>>, vector<12x128xf32>,
    return
  }
  func.func @transform_0(%arg0: i32, %arg1: i32) -> (i32, i32) {
    %c0_i32 = arith.constant 0 : i32
    return %arg0, %arg1 : i32, i32
  }
  func.func @transform_1(%arg0: i32, %arg1: i32) -> (i32, i32) {
    %c0_i32 = arith.constant 0 : i32
    %c0_i32_0 = arith.constant 0 : i32
    %c0_i32_1 = arith.constant 0 : i32
    return %c0_i32, %c0_i32_0 : i32, i32
  }
  func.func @transform_2(%arg0: i32, %arg1: i32) -> (i32, i32) {
    %c0_i32 = arith.constant 0 : i32
    %c0_i32_0 = arith.constant 0 : i32
    return %c0_i32, %arg0 : i32, i32
  }
}

</mosaic_0001>

<bundles_post_ra>
// kernel: tpu_custom_call.1
= control target key start
LH: loop header
LB: loop body
LE: loop exit
PB: predicated region body
PF: predicated region fallthrough
CT: control target
= control target key end

     0   :  { %7 = vsyncpa [#allocation3], 0  ;;  %s735_s0 = inlined_call_operand.vmem [shape: bf16[256,32], index: 0, kind: input, shape index: {}]   ;;  %s736_s1 = inlined_call_operand.vmem [shape: bf16[12,32], index: 1, kind: input, shape index: {}]   ;;  %s737_s2 = inlined_call_operand.hbm [shape: f32[12,256], index: 2, kind: output, shape index: {}]  }
   0x1   :  { %9 = vsyncpa [#allocation3 + $0x1], 0  ;;  %s609_s9 = smov 0   ;;  %s611_s10 = smov 0  }
   0x2   :  { %s613_s11 = smov 0   ;;  %s615_s12 = smov 0  }
   0x3   :  { %s617_s13 = smov 0   ;;  %s619_s14 = smov 0  }
   0x4 LB: > { %s388_s15 = sadd.s32 4294967295, %s586_s14   ;;  %s389_s16 = sadd.s32 4294967294, %s586_s14   ;;  %s586_s14 = sphi %s619_s14, %s15_s14   ;;  %s582_s13 = sphi %s617_s13, %s744_s13   ;;  %s578_s12 = sphi %s615_s12, %s743_s12   ;;  %s574_s11 = sphi %s613_s11, %s742_s11   ;;  %s570_s10 = sphi %s611_s10, %s741_s10   ;;  %s566_s9 = sphi %s609_s9, %s740_s9  }
   0x5   : > { %s27_s17 = sadd.s32 1, %s582_s13  ;;  %s83_s18 = sadd.s32 1, %s574_s11 }
   0x6   : > { %p29_p0 = scmp.ge.s32.totalorder %s27_s17, 2  ;;  %p93_p1 = scmp.ne.s32.totalorder %s574_s11, %s570_s10 }
   0x7   : > { %p94_p2 = scmp.eq.s32.totalorder %s388_s15, 1  ;;  %p99_p3 = scmp.ne.s32.totalorder %s570_s10, %s566_s9 }
   0x8   : > { %s746_s17 = smov (%p29_p0, %s27_s17), 0  ;;  %p100_p5 = scmp.eq.s32.totalorder %s389_s16, 1 }
   0x9   : > { %p649_p4 = por %p94_p2, %p93_p1  ;;  %s80_s20 = ssub.s32 %s582_s13, %s746_s17 }
   0xa   : > { %p392_p6 = scmp.ge.s32.totalorder %s586_s14, 1  ;;  %p81_p7 = scmp.eq.s32.totalorder %s80_s20, 0 }
   0xb   : > { %p656_p8 = por %p100_p5, %p99_p3  ;;  %p133_p9 = scmp.lt.s32.totalorder %s586_s14, 3 }
   0xc   : > { %s662_s22 = scalar_select %p81_p7, %s574_s11, %s83_s18  }
   0xd   : > { %p134_p10 = pnand %p392_p6, %p133_p9 }
   0xe   : > { %s394_s23 = sshll.u32 (!%p134_p10), %s578_s12, 4  ;;  %v588_v0 = vmov (!%p134_p10), 0.0   ;;  %vm589_vm0 = vmmov (!%p134_p10), 0   ;;  %vm231_vm1 = vcmask (!%p134_p10), 261120   ;;  %v507_v17 = vld [vmem:[%s736_s1] sm:$0x3f] (!%p134_p10)  }
   0xf   : > { %137 = sbr.rel (%p134_p10) target bundleno = 320 (0x140), region = 28  ;;  %419 = vmatprep.subr.bf16.mxu0 (!%p134_p10), %v588_v0  ;;  %p159_p11 = scmp.lt.s32.totalorder (!%p134_p10), %s394_s23, 31  ;;  %435 = vmatprep.mubr.msk.bf16.mxu0 (!%p134_p10), %vm589_vm0, %v588_v0 }
  0x10   : > { %s155_s30 = sand.u32 (!%p134_p10), 1, %s570_s10   ;;  %s407_s6 = sshll.u32 (!%p134_p10), %s578_s12, 7 }
  0x11   : > { %s393_s3 = sshll.u32 (!%p134_p10), %s155_s30, 4  ;;  %s687_s15 = scalar_lea.hbm (!%p134_p10), %s737_s2, %s407_s6 }
  0x12   : > { %s157_s4 = scalar_lea.vmem (!%p134_p10), [#allocation2], %s393_s3  ;;  %s689_s16 = scalar_lea.sflag (!%p134_p10), [#allocation3], %s155_s30 }
  0x13   : > { %s315_s5 = sshll.u32 (!%p134_p10), %s157_s4, 4  ;;  %s590_s12 = smov (!%p134_p10), [#allocation2]   ;;  %s682_s5 = int_to_ptr.vmem [resolvable:$true] %s315_s5 }
  0x14   : > { %s508_s18 = scalar_lea.vmem (!%p134_p10), %s682_s5, 256  ;;  %s512_s20 = sshll.u32 (!%p134_p10), %s590_s12, 4  ;;  %s513_s20 = int_to_ptr.vmem [resolvable:$false] %s512_s20 }
  0x15   : > { %p509_p12 = scmp.ne.s32.totalorder (!%p134_p10), %s682_s5, %s508_s18  ;;  %p515_p1 = scmp.lt.s32.totalorder (!%p134_p10), %s682_s5, %s513_s20 }
  0x16   : > { %s748_s23 = smov (!%p159_p11, %s394_s23), 31 }
  0x17   : > { %s395_s24 = sshll.u32 %s748_s23, 2  ;;  %p510_p13 = pnand %p509_p12, %p649_p4 }
  0x18   : > { %s165_s27 = scalar_lea.vmem %s735_s0, %s395_s24  ;;  %s514_s23 = scalar_lea.vmem %s513_s20, 512 }
  0x19   : > { %v499_v1 = vld [vmem:[%s165_s27] sm:$0xff]   ;;  %v500_v3 = vld [vmem:[%s165_s27 + $0x8] sm:$0xff]   ;;  %v501_v5 = vld [vmem:[%s165_s27 + $0x10] sm:$0xff]   ;;  %p511_p0 = pneg %p510_p13  ;;  %p516_p2 = scmp.lt.s32.totalorder %s514_s23, %s508_s18 }
  0x1a   : > { %v236_v2 = vsel %vm231_vm1, %v499_v1, 0  ;;  %v239_v4 = vsel %vm231_vm1, %v500_v3, 0  ;;  %v242_v6 = vsel %vm231_vm1, %v501_v5, 0  ;;  %v502_v7 = vld [vmem:[%s165_s27 + $0x18] sm:$0xff]   ;;  %v503_v9 = vld [vmem:[%s165_s27 + $0x20] sm:$0xff]   ;;  %v504_v11 = vld [vmem:[%s165_s27 + $0x28] sm:$0xff]  }
  0x1b   : > { %420 = vmatpush3.bf16.xpose.msra.mxu0 %v236_v2  ;;  %v245_v8 = vsel %vm231_vm1, %v502_v7, 0  ;;  %v248_v10 = vsel %vm231_vm1, %v503_v9, 0  ;;  %v251_v12 = vsel %vm231_vm1, %v504_v11, 0  ;;  %v505_v13 = vld [vmem:[%s165_s27 + $0x30] sm:$0xff]   ;;  %v506_v15 = vld [vmem:[%s165_s27 + $0x38] sm:$0xff]   ;;  %p517_p3 = por %p516_p2, %p515_p1 }
  0x1c   : > { %421 = vmatprep.subr.bf16.mxu0 %v588_v0  ;;  %v254_v14 = vsel %vm231_vm1, %v505_v13, 0  ;;  %v257_v16 = vsel %vm231_vm1, %v506_v15, 0 }
  0x1d   : > { %p518_p5 = pnand %p517_p3, %p511_p0 }
  0x23   : > { %422 = vmatpush3.bf16.xpose.msra.mxu0 %v239_v4 }
  0x24   : > { %423 = vmatprep.subr.bf16.mxu0 %v588_v0 }
  0x2b   : > { %424 = vmatpush3.bf16.xpose.msra.mxu0 %v242_v6 }
  0x2c   : > { %425 = vmatprep.subr.bf16.mxu0 %v588_v0 }
  0x33   : > { %426 = vmatpush3.bf16.xpose.msra.mxu0 %v245_v8 }
  0x34   : > { %427 = vmatprep.subr.bf16.mxu0 %v588_v0 }
  0x3b   : > { %428 = vmatpush3.bf16.xpose.msra.mxu0 %v248_v10 }
  0x3c   : > { %429 = vmatprep.subr.bf16.mxu0 %v588_v0 }
  0x43   : > { %430 = vmatpush3.bf16.xpose.msra.mxu0 %v251_v12 }
  0x44   : > { %431 = vmatprep.subr.bf16.mxu0 %v588_v0 }
  0x4b   : > { %432 = vmatpush3.bf16.xpose.msra.mxu0 %v254_v14 }
  0x4c   : > { %433 = vmatprep.subr.bf16.mxu0 %v588_v0 }
  0x53   : > { %434 = vmatpush3.bf16.xpose.msra.mxu0 %v257_v16 }
  0x5a   : > { %436 = vmatmul.mubr.msk.bf16.vlgmr.msra.gmra.mrb[0].mxu0 %vm231_vm1, %v507_v17 }
 0x12d   : > { %v293_v18 = vpop.f32.mrb[0].mxu0 }
 0x12e   : > { %300 = vst [vmem:[%s157_s4] sm:$0xff] %v293_v18  ;;  %v437_v19 = vpop.f32.mrb[1].mxu0 }
 0x12f   : > { %v296_v20 = vpop.f32.mrb[2].mxu0 }
 0x130   : > { %301 = vst [vmem:[%s157_s4 + $0x8] sm:$0xf] %v296_v20  ;;  %v438_v21 = vpop.f32.mrb[3].mxu0 }
 0x131   : > { %521 = shalt.err (!%p518_p5)
}
 0x132   : > { %s522_s24 = scalar_lea.hbm %s687_s15, 256  ;;  %s526_s27 = scalar_lea.hbm %s737_s2, 512 }
 0x133   : > { %p523_p6 = scmp.ne.s32.totalorder %s687_s15, %s522_s24  ;;  %p527_p10 = scmp.lt.u32.totalorder %s687_s15, %s737_s2 }
 0x134   : > { %p528_p11 = scmp.lt.u32.totalorder %s526_s27, %s522_s24  ;;  %p530_p13 = scmp.lt.u32.totalorder %s522_s24, %s687_s15 }
 0x135   : > { %p524_p7 = pnand %p523_p6, %p649_p4 }
 0x136   : > { %p529_p12 = por %p528_p11, %p527_p10 }
 0x137   : > { %p525_p9 = pneg %p524_p7 }
 0x138   : > { %p531_p0 = por %p530_p13, %p529_p12 }
 0x13a   : > { %p532_p1 = pnand %p531_p0, %p525_p9 }
 0x13c   : > { %535 = shalt.err (!%p532_p1)
}
 0x13d   : > { %s591_s30 = smov 128   ;;  %s592_s3 = smov 256  }
 0x13e   : > { %s593_s4 = smov 8  }
 0x13f   : > { %439 = dma.vmem_to_hbm [thread:$0]  (%p649_p4), %s682_s5, 256, %s687_s15, %s689_s16, %s591_s30, %s592_s3, %s593_s4  }
 0x140 PF: > { %p445_p2 = scmp.ge.s32.totalorder %s586_s14, 2  ;;  %s330_s6 = sand.u32 1, %s566_s9  }
 0x141   : > { %s331_s7 = scalar_lea.sflag [#allocation3], %s330_s6 }
 0x142   : > { %p442_p3 = pnand %p445_p2, %p656_p8 }
 0x144   : > { %561 = dma.done.wait (!%p442_p3), %s331_s7, 256  }
 0x145   : > { %563 = vsyncadd (!%p442_p3), %s331_s7, 4294967040  ;;  %s15_s14 = sadd.s32 1, %s586_s14   ;;  %s740_s9 = smov %s570_s10 }
 0x146   : > { %p12_p5 = scmp.ge.s32.totalorder %s15_s14, 4   ;;  %s741_s10 = smov %s574_s11 }
 0x147   : > { %s742_s11 = smov %s662_s22  ;;  %s743_s12 = smov %s582_s13 }
 0x148   : > { %s744_s13 = smov %s746_s17  ;;  %14 = sbr.rel (!%p12_p5) target bundleno = 4 (0x4), region = 63 }
 0x14f   :  { %336 = vsyncpa [#allocation3], 1 }
 0x150   :  { %338 = vsyncpa [#allocation3 + $0x1], 1 }

</bundles_post_ra>
